<compile_context>
chip_gen: v7x
topology: tpu7x:2x2x1
jax: 0.10.0
libtpu: 0.0.40
codegen_flags: <defaults>
</compile_context>

<pallas_src>
import math
from functools import partial

import jax
import jax.numpy as jnp
from jax import lax
from jax.experimental import pallas as pl
from jax.experimental.pallas import tpu as pltpu


_MASK_NEG = -1e30  # finite sentinel: avoids NaN for fully-masked rows


# --------------------------------------------------------------------------- #
# Kernels
# --------------------------------------------------------------------------- #
def _store_out(out_ref, out_f32, fold_out, hb):
    """Store the (Hb, tq, Dv) f32 context, optionally folded to (tq, Hb*Dv)."""
    if fold_out:
        parts = [out_f32[i] for i in range(hb)]
        out2d = parts[0] if hb == 1 else jnp.concatenate(parts, axis=-1)
        out_ref[...] = out2d.astype(out_ref.dtype)
    else:
        out_ref[...] = out_f32.astype(out_ref.dtype)


def _attn_probs_kernel(*refs, scale, has_amask, has_hmask, emit_attn, fold_out, hb):
    """Full-row softmax; K/V resident across the q-tile axis.  Emits attn probs."""
    q_ref, k_ref, v_ref = refs[:3]
    idx = 3
    amask_ref = hmask_ref = None
    if has_amask:
        amask_ref = refs[idx]
        idx += 1
    if has_hmask:
        hmask_ref = refs[idx]
        idx += 1
    out_ref = refs[idx]
    attn_ref = refs[idx + 1] if emit_attn else None

    # 1/sqrt(dim_qk) folded into q in its *native* dtype; MXU accumulates in f32.
    q = q_ref[...] * jnp.asarray(scale, dtype=q_ref.dtype)       # (Hb, tq, Dqk)
    s = lax.dot_general(
        q, k_ref[...],
        dimension_numbers=(((2,), (2,)), ((0,), (0,))),
        preferred_element_type=jnp.float32)                      # (Hb, tq, Sk)

    if has_amask:
        s = jnp.where(amask_ref[...] == 0, _MASK_NEG, s)

    # Numerically stable softmax along Sk (f32 accumulation).
    m = jnp.max(s, axis=-1, keepdims=True)
    p = jnp.exp(s - m)
    denom = jnp.sum(p, axis=-1, keepdims=True)
    attn = (p * pl.reciprocal(denom)).astype(q_ref.dtype)        # torch type_as parity
    if has_hmask:
        attn = attn * hmask_ref[...].astype(attn.dtype)
    if attn_ref is not None:
        attn_ref[...] = attn

    out = lax.dot_general(
        attn, v_ref[...],
        dimension_numbers=(((2,), (1,)), ((0,), (0,))),
        preferred_element_type=jnp.float32)                      # (Hb, tq, Dv)
    _store_out(out_ref, out, fold_out, hb)


def _attn_flash_kernel(*refs, scale, has_amask, has_hmask, fold_out, hb):
    """Online-softmax path (no attn-probs output); Sk tiled on the last grid axis."""
    q_ref, k_ref, v_ref = refs[:3]
    idx = 3
    amask_ref = hmask_ref = None
    if has_amask:
        amask_ref = refs[idx]
        idx += 1
    if has_hmask:
        hmask_ref = refs[idx]
        idx += 1
    out_ref = refs[idx]
    m_sc, l_sc, acc_sc = refs[idx + 1:idx + 4]

    kv = pl.program_id(2)

    @pl.when(kv == 0)
    def _():
        m_sc[...] = jnp.full(m_sc.shape, -jnp.inf, dtype=m_sc.dtype)
        l_sc[...] = jnp.zeros(l_sc.shape, dtype=l_sc.dtype)
        acc_sc[...] = jnp.zeros(acc_sc.shape, dtype=acc_sc.dtype)

    q = q_ref[...] * jnp.asarray(scale, dtype=q_ref.dtype)
    s = lax.dot_general(
        q, k_ref[...],
        dimension_numbers=(((2,), (2,)), ((0,), (0,))),
        preferred_element_type=jnp.float32)                      # (Hb, tq, tk)
    if has_amask:
        s = jnp.where(amask_ref[...] == 0, _MASK_NEG, s)

    m_prev = m_sc[...]
    m_new = jnp.maximum(m_prev, jnp.max(s, axis=-1, keepdims=True))
    alpha = jnp.exp(m_prev - m_new)
    p = jnp.exp(s - m_new)
    # Softmax denominator counts every key; the head mask is applied *after*
    # softmax (PyTorch semantics), so it only gates the value accumulation.
    l_sc[...] = alpha * l_sc[...] + jnp.sum(p, axis=-1, keepdims=True)
    pv = p.astype(v_ref.dtype)
    if has_hmask:
        pv = pv * hmask_ref[...].astype(pv.dtype)
    acc_sc[...] = alpha * acc_sc[...] + lax.dot_general(
        pv, v_ref[...],
        dimension_numbers=(((2,), (1,)), ((0,), (0,))),
        preferred_element_type=jnp.float32)
    m_sc[...] = m_new

    @pl.when(kv == pl.num_programs(2) - 1)
    def _():
        out = acc_sc[...] * pl.reciprocal(l_sc[...], approx=True)
        _store_out(out_ref, out, fold_out, hb)


# --------------------------------------------------------------------------- #
# Tiling heuristics
# --------------------------------------------------------------------------- #
def _vmem_budget_bytes():
    """Generation-aware VMEM budget: ~3/4 of physical (96 MiB cap); 48 MiB if
    the hardware query is unavailable (conservative for v7x's 64 MiB/TC)."""
    cap = None
    try:
        cap = getattr(pltpu.get_tpu_info(), "vmem_capacity_bytes", None)
    except Exception:
        cap = None
    if not cap:
        cap = 64 * 1024 * 1024
    return int(min(int(cap) * 3 // 4, 96 * 1024 * 1024))


def _largest_aligned_divisor(n, limit, align):
    """Largest divisor of n that is a multiple of `align` and <= limit.
    Falls back to n itself (full extent) if no such divisor exists."""
    best = None
    upper = min(n, max(limit, align))
    for cand in range(align, upper + 1, align):
        if n % cand == 0:
            best = cand
    return best if best is not None else n


def _choose_hb(bh, dim_qk, dim_v, tq, sk_blk, itemsize, budget):
    """Heads packed per grid step.  Large q tiles are preferred over head
    packing; heads are packed only to widen the folded context store toward 128
    lanes, capped so the f32 logits tile and the resident K/V stay small, and
    keeping >= 2 head groups (megacore splits the K/V-resident axis)."""
    cap = 8
    if dim_v < 128:
        cap = min(cap, max(1, 128 // max(dim_v, 1)))
    else:
        cap = 1
    # f32 logits tile (Hb, tq, Sk_blk) under ~4 MiB -> bounded vreg/spill pressure.
    cap = min(cap, max(1, (4 * 1024 * 1024) // max(1, tq * sk_blk * 4)))
    # Double-buffered resident K/V under ~half the VMEM budget.
    cap = min(cap, max(1, (budget // 2) // max(1, 2 * sk_blk * (dim_qk + dim_v) * itemsize)))
    for cand in range(min(cap, bh), 0, -1):
        if bh % cand == 0 and (bh // cand >= 2 or bh == 1):
            return cand
    return 1


def _choose_tq(Sq, sk_blk, sk_probs, dim_qk, dim_v, hb, mask_isz, itemsize,
               emit_attn, budget, align):
    """q-tile rows: big tiles amortize per-grid-step overhead, bounded by what
    fits in VMEM with double-buffered blocks + f32 temporaries."""
    fixed = 2 * hb * sk_blk * (dim_qk + dim_v) * itemsize            # resident K/V
    per_row = (2 * hb * (dim_qk + dim_v) * itemsize                  # q + out blocks
               + 2 * hb * sk_blk * mask_isz                          # mask blocks
               + (2 * hb * sk_probs * itemsize if emit_attn else 0)  # attn-probs block
               + 4 * hb * sk_blk * 4)                                # f32 s/p temporaries
    avail = max(budget - fixed, per_row * align)
    limit = min(512, avail // per_row)
    limit = max(align, (limit // align) * align)
    return _largest_aligned_divisor(Sq, limit, align)


# --------------------------------------------------------------------------- #
# Wrapper
# --------------------------------------------------------------------------- #
def self_attention(q, k, v, attention_mask=None, head_mask=None,
                   return_attn_probs=True, kv_block_size=None):
    """Pallas TPU equivalent of SelfAttention.forward (eval mode).

    Returns (out, attn_probs).  attn_probs is None when return_attn_probs=False
    (perf escape hatch enabling the flash/online-softmax path for long Sk)."""
    b, h, *q_shape, dim_qk = q.shape
    _, _, *kv_shape, _ = k.shape
    dim_v = v.shape[-1]
    Sq = int(math.prod(q_shape)) if q_shape else 1
    Sk = int(math.prod(kv_shape)) if kv_shape else 1
    bh = b * h

    qf = q.reshape(bh, Sq, dim_qk)
    kf = k.reshape(bh, Sk, dim_qk)
    vf = v.reshape(bh, Sk, dim_v)

    def _prep_mask(m):
        if m is None:
            return None
        m = jnp.broadcast_to(m, (b, h, Sq, Sk)).reshape(bh, Sq, Sk)
        # Keep narrow dtypes narrow (HBM/VMEM traffic); only bools need widening.
        if m.dtype == jnp.bool_:
            m = m.astype(jnp.int8)
        return m

    amask = _prep_mask(attention_mask)
    hmask = _prep_mask(head_mask)
    has_amask = amask is not None
    has_hmask = hmask is not None
    mask_isz = sum(jnp.dtype(m.dtype).itemsize for m in (amask, hmask) if m is not None)

    itemsize = jnp.dtype(q.dtype).itemsize
    align = 16 if itemsize <= 2 else 8
    budget = _vmem_budget_bytes()
    scale = 1.0 / math.sqrt(float(dim_qk))

    # ---- kv tiling: flash path only when attn probs are not requested -------
    use_flash = False
    tk = Sk
    if not return_attn_probs:
        # Mask blocks put tk on the lane axis -> multiple of 128 when masks exist.
        kv_align = 128 if (has_amask or has_hmask) else align
        target = kv_block_size if kv_block_size else 512
        tk = _largest_aligned_divisor(Sk, min(target, Sk), kv_align)
        use_flash = tk < Sk
        if not use_flash:
            tk = Sk

    sk_blk = tk if use_flash else Sk
    tq_target = _largest_aligned_divisor(Sq, 512, align)
    hb = _choose_hb(bh, dim_qk, dim_v, tq_target, sk_blk, itemsize, budget)
    tq = _choose_tq(Sq, sk_blk, Sk, dim_qk, dim_v, hb, mask_isz, itemsize,
                    return_attn_probs, budget, align)
    n_groups = bh // hb
    n_q = Sq // tq
    fold_out = (dim_v < 128) and (hb > 1)
    out_dtype = q.dtype

    kernel_kwargs = dict(scale=scale, has_amask=has_amask, has_hmask=has_hmask,
                         fold_out=fold_out, hb=hb)
    inputs = [qf, kf, vf]

    if not use_flash:
        in_specs = [
            pl.BlockSpec((hb, tq, dim_qk), lambda g, i: (g, i, 0)),
            # K/V resident across the q-tile axis: block index ignores i.
            pl.BlockSpec((hb, Sk, dim_qk), lambda g, i: (g, 0, 0)),
            pl.BlockSpec((hb, Sk, dim_v), lambda g, i: (g, 0, 0)),
        ]
        if has_amask:
            in_specs.append(pl.BlockSpec((hb, tq, Sk), lambda g, i: (g, i, 0)))
            inputs.append(amask)
        if has_hmask:
            in_specs.append(pl.BlockSpec((hb, tq, Sk), lambda g, i: (g, i, 0)))
            inputs.append(hmask)

        if fold_out:
            out_shape = [jax.ShapeDtypeStruct((n_groups, Sq, hb * dim_v), out_dtype)]
            out_specs = [pl.BlockSpec((None, tq, hb * dim_v), lambda g, i: (g, i, 0))]
        else:
            out_shape = [jax.ShapeDtypeStruct((bh, Sq, dim_v), out_dtype)]
            out_specs = [pl.BlockSpec((hb, tq, dim_v), lambda g, i: (g, i, 0))]
        if return_attn_probs:
            out_shape.append(jax.ShapeDtypeStruct((bh, Sq, Sk), out_dtype))
            out_specs.append(pl.BlockSpec((hb, tq, Sk), lambda g, i: (g, i, 0)))

        kernel = partial(_attn_probs_kernel, emit_attn=return_attn_probs,
                         **kernel_kwargs)
        grid = (n_groups, n_q)
        semantics = ("parallel", "arbitrary")
        scratch_shapes = ()
    else:
        in_specs = [
            pl.BlockSpec((hb, tq, dim_qk), lambda g, i, j: (g, i, 0)),
            pl.BlockSpec((hb, tk, dim_qk), lambda g, i, j: (g, j, 0)),
            pl.BlockSpec((hb, tk, dim_v), lambda g, i, j: (g, j, 0)),
        ]
        if has_amask:
            in_specs.append(pl.BlockSpec((hb, tq, tk), lambda g, i, j: (g, i, j)))
            inputs.append(amask)
        if has_hmask:
            in_specs.append(pl.BlockSpec((hb, tq, tk), lambda g, i, j: (g, i, j)))
            inputs.append(hmask)

        if fold_out:
            out_shape = [jax.ShapeDtypeStruct((n_groups, Sq, hb * dim_v), out_dtype)]
            out_specs = [pl.BlockSpec((None, tq, hb * dim_v), lambda g, i, j: (g, i, 0))]
        else:
            out_shape = [jax.ShapeDtypeStruct((bh, Sq, dim_v), out_dtype)]
            out_specs = [pl.BlockSpec((hb, tq, dim_v), lambda g, i, j: (g, i, 0))]

        kernel = partial(_attn_flash_kernel, **kernel_kwargs)
        grid = (n_groups, n_q, Sk // tk)
        semantics = ("parallel", "arbitrary", "arbitrary")
        scratch_shapes = (pltpu.VMEM((hb, tq, 1), jnp.float32),
                          pltpu.VMEM((hb, tq, 1), jnp.float32),
                          pltpu.VMEM((hb, tq, dim_v), jnp.float32))

    # Advisory cost estimate for XLA's scheduler around the custom call.
    flops = 2 * bh * Sq * Sk * (dim_qk + dim_v)
    bytes_accessed = ((qf.size + kf.size + vf.size) * itemsize
                      + sum(int(m.size) * jnp.dtype(m.dtype).itemsize
                            for m in (amask, hmask) if m is not None)
                      + bh * Sq * dim_v * itemsize
                      + (bh * Sq * Sk * itemsize if return_attn_probs else 0))
    cost = pl.CostEstimate(flops=int(flops), transcendentals=int(bh * Sq * Sk),
                           bytes_accessed=int(bytes_accessed))

    results = pl.pallas_call(
        kernel,
        out_shape=tuple(out_shape),
        grid_spec=pltpu.PrefetchScalarGridSpec(
            num_scalar_prefetch=0,
            grid=grid,
            in_specs=tuple(in_specs),
            out_specs=tuple(out_specs),
            scratch_shapes=scratch_shapes,
        ),
        compiler_params=pltpu.CompilerParams(
            dimension_semantics=semantics,
            vmem_limit_bytes=int(budget),
        ),
        cost_estimate=cost,
    )(*inputs)

    if return_attn_probs:
        out_flat, attn_flat = results
    else:
        out_flat = results[0] if isinstance(results, (tuple, list)) else results
        attn_flat = None

    if fold_out:
        out_flat = out_flat.reshape(n_groups, Sq, hb, dim_v)
        out_flat = jnp.swapaxes(out_flat, 1, 2).reshape(bh, Sq, dim_v)

    out = out_flat.reshape(b, h, *q_shape, dim_v)
    attn_probs = attn_flat.reshape(b, h, Sq, Sk) if attn_flat is not None else None
    return out, attn_probs


# --------------------------------------------------------------------------- #
# Pure-JAX reference (mirrors the PyTorch module)
# --------------------------------------------------------------------------- #
def _reference(q, k, v, attention_mask=None, head_mask=None):
    b, h, *q_shape, dim_qk = q.shape
    _, _, *kv_shape, _ = k.shape
    dim_v = v.shape[-1]
    Sq = int(math.prod(q_shape)) if q_shape else 1
    Sk = int(math.prod(kv_shape)) if kv_shape else 1
    qf = q.reshape(b, h, Sq, dim_qk).astype(jnp.float32)
    kf = k.reshape(b, h, Sk, dim_qk).astype(jnp.float32)
    vf = v.reshape(b, h, Sk, dim_v).astype(jnp.float32)
    s = jnp.matmul(qf, jnp.swapaxes(kf, -1, -2)) / jnp.sqrt(jnp.float32(dim_qk))
    if attention_mask is not None:
        s = jnp.where(attention_mask == 0, -jnp.inf, s)
    a = jax.nn.softmax(s, axis=-1)
    if head_mask is not None:
        a = a * head_mask
    o = jnp.matmul(a, vf)
    return o.reshape(b, h, *q_shape, dim_v), a


if __name__ == "__main__":
    key = jax.random.PRNGKey(0)
    kq, kk, kv_, km, kh, kq2, kk2, kv2, km2, kh2 = jax.random.split(key, 10)

    # (b, h, d1, d2, dim) — 2-D latent grid of 4x4 tokens -> Sq = Sk = 16.
    b, h, d1, d2, dim_qk, dim_v = 2, 2, 4, 4, 8, 8
    q = jax.random.normal(kq, (b, h, d1, d2, dim_qk), dtype=jnp.float32)
    k = jax.random.normal(kk, (b, h, d1, d2, dim_qk), dtype=jnp.float32)
    v = jax.random.normal(kv_, (b, h, d1, d2, dim_v), dtype=jnp.float32)

    Sq = Sk = d1 * d2
    attn_mask = (jax.random.uniform(km, (b, h, Sq, Sk)) > 0.3).astype(jnp.float32)
    attn_mask = jnp.maximum(attn_mask, jnp.eye(Sq, Sk)[None, None])
    hd_mask = (jax.random.uniform(kh, (b, h, Sq, Sk)) > 0.2).astype(jnp.float32)

    # 1) attention mask only
    out, attn_probs = self_attention(q, k, v, attention_mask=attn_mask)
    jax.block_until_ready((out, attn_probs))
    out_ref, attn_ref = _reference(q, k, v, attention_mask=attn_mask)
    assert out.shape == (b, h, d1, d2, dim_v)
    assert attn_probs.shape == (b, h, Sq, Sk)
    assert jnp.allclose(out, out_ref, atol=1e-5, rtol=1e-5)
    assert jnp.allclose(attn_probs, attn_ref, atol=1e-5, rtol=1e-5)

    # 2) no masks (specialized variant without mask inputs)
    out2, attn2 = self_attention(q, k, v)
    jax.block_until_ready((out2, attn2))
    out2_ref, attn2_ref = _reference(q, k, v)
    assert jnp.allclose(out2, out2_ref, atol=1e-5, rtol=1e-5)
    assert jnp.allclose(attn2, attn2_ref, atol=1e-5, rtol=1e-5)

    # 3) attention mask + head mask
    out3, attn3 = self_attention(q, k, v, attention_mask=attn_mask, head_mask=hd_mask)
    jax.block_until_ready((out3, attn3))
    out3_ref, attn3_ref = _reference(q, k, v, attention_mask=attn_mask, head_mask=hd_mask)
    assert jnp.allclose(out3, out3_ref, atol=1e-5, rtol=1e-5)
    assert jnp.allclose(attn3, attn3_ref, atol=1e-5, rtol=1e-5)

    # 4) output-only fast path (no attn-probs HBM write), single kv tile
    out4, attn4 = self_attention(q, k, v, attention_mask=attn_mask,
                                 return_attn_probs=False)
    jax.block_until_ready(out4)
    assert attn4 is None
    assert jnp.allclose(out4, out_ref, atol=1e-5, rtol=1e-5)

    # 5) flash / online-softmax path: longer sequence, Sk tiled into 2 kv blocks
    b5, h5, e1, e2, d5 = 1, 2, 16, 16, 16
    S5 = e1 * e2
    q5 = jax.random.normal(kq2, (b5, h5, e1, e2, d5), dtype=jnp.float32)
    k5 = jax.random.normal(kk2, (b5, h5, e1, e2, d5), dtype=jnp.float32)
    v5 = jax.random.normal(kv2, (b5, h5, e1, e2, d5), dtype=jnp.float32)
    am5 = (jax.random.uniform(km2, (b5, h5, S5, S5)) > 0.3).astype(jnp.float32)
    am5 = jnp.maximum(am5, jnp.eye(S5, S5)[None, None])
    hm5 = (jax.random.uniform(kh2, (b5, h5, S5, S5)) > 0.2).astype(jnp.float32)
    out5, attn5 = self_attention(q5, k5, v5, attention_mask=am5, head_mask=hm5,
                                 return_attn_probs=False, kv_block_size=128)
    jax.block_until_ready(out5)
    out5_ref, _ = _reference(q5, k5, v5, attention_mask=am5, head_mask=hm5)
    assert attn5 is None
    assert jnp.allclose(out5, out5_ref, atol=5e-3, rtol=5e-3)

    # 6) bf16 inputs exercise the native-dtype MXU path (loose tolerance)
    qb, kb, vb = (x.astype(jnp.bfloat16) for x in (q, k, v))
    out6, attn6 = self_attention(qb, kb, vb, attention_mask=attn_mask)
    jax.block_until_ready((out6, attn6))
    out6_ref, _ = _reference(qb.astype(jnp.float32), kb.astype(jnp.float32),
                             vb.astype(jnp.float32), attention_mask=attn_mask)
    assert out6.dtype == jnp.bfloat16 and attn6.dtype == jnp.bfloat16
    assert jnp.allclose(out6.astype(jnp.float32), out6_ref, atol=2e-2, rtol=2e-2)

    print("KERNEL_OK")
</pallas_src>

<mosaic_0001>
module attributes {stable_mosaic.version = 11 : i64} {
  func.func @_attn_probs_kernel(%arg0: i32, %arg1: i32, %arg2: memref<2x16x8xf32, #tpu.memory_space<vmem>>, %arg3: memref<2x16x8xf32, #tpu.memory_space<vmem>>, %arg4: memref<2x16x8xf32, #tpu.memory_space<vmem>>, %arg5: memref<2x16x16xf32, #tpu.memory_space<vmem>>, %arg6: memref<1x16x16xf32, #tpu.memory_space<vmem>>, %arg7: memref<2x16x16xf32, #tpu.memory_space<vmem>>) attributes {dimension_semantics = [#tpu.dimension_semantics<parallel>, #tpu.dimension_semantics<arbitrary>], iteration_bounds = array<i64: 2, 1>, scalar_prefetch = 0 : i64, scratch_operands = 0 : i64, tpu.core_type = #tpu.core_type<tc>, window_params = [{transform_indices = @transform_0, window_bounds = array<i64: 2, 16, 8>}, {transform_indices = @transform_1, window_bounds = array<i64: 2, 16, 8>}, {transform_indices = @transform_2, window_bounds = array<i64: 2, 16, 8>}, {transform_indices = @transform_3, window_bounds = array<i64: 2, 16, 16>}, {transform_indices = @transform_4, window_bounds = array<i64: 1, 16, 16>}, {transform_indices = @transform_5, window_bounds = array<i64: 2, 16, 16>}]} {
    %c0 = arith.constant 0 : index
    %c0_0 = arith.constant 0 : index
    %c0_1 = arith.constant 0 : index
    %0 = vector.load %arg2[%c0, %c0_0, %c0_1] : memref<2x16x8xf32, #tpu.memory_space<vmem>>, vector<2x16x8xf32>
    %cst = arith.constant 0.353553385 : f32
    %1 = vector.broadcast %cst : f32 to vector<2x16x8xf32>
    %2 = arith.mulf %0, %1 : vector<2x16x8xf32>
    %c0_2 = arith.constant 0 : index
    %c0_3 = arith.constant 0 : index
    %c0_4 = arith.constant 0 : index
    %3 = vector.load %arg3[%c0_2, %c0_3, %c0_4] : memref<2x16x8xf32, #tpu.memory_space<vmem>>, vector<2x16x8xf32>
    %cst_5 = arith.constant dense<0.000000e+00> : vector<2x16x16xf32>
    %4 = tpu.matmul %2, %3, %cst_5 {dimension_numbers = #tpu.dot_dimension_numbers<[2], [2], [1], [1], [0, 0, 0, 1, 1, 1], [0], [0]>} : vector<2x16x8xf32>, vector<2x16x8xf32>, vector<2x16x16xf32> -> vector<2x16x16xf32>
    %c0_6 = arith.constant 0 : index
    %c0_7 = arith.constant 0 : index
    %c0_8 = arith.constant 0 : index
    %5 = vector.load %arg5[%c0_6, %c0_7, %c0_8] : memref<2x16x16xf32, #tpu.memory_space<vmem>>, vector<2x16x16xf32>
    %cst_9 = arith.constant 0.000000e+00 : f32
    %6 = vector.broadcast %cst_9 : f32 to vector<2x16x16xf32>
    %7 = arith.cmpf oeq, %5, %6 : vector<2x16x16xf32>
    %cst_10 = arith.constant -1.000000e+30 : f32
    %8 = vector.broadcast %cst_10 : f32 to vector<2x16x16xf32>
    %9 = arith.select %7, %8, %4 : vector<2x16x16xi1>, vector<2x16x16xf32>
    %cst_11 = arith.constant dense<0xFF800000> : vector<2x16xf32>
    %10 = vector.multi_reduction <maximumf>, %9, %cst_11 [2] : vector<2x16x16xf32> to vector<2x16xf32>
    %11 = vector.shape_cast %10 : vector<2x16xf32> to vector<2x16x1xf32>
    %12 = vector.broadcast %11 : vector<2x16x1xf32> to vector<2x16x16xf32>
    %13 = arith.subf %9, %12 : vector<2x16x16xf32>
    %14 = math.exp %13 : vector<2x16x16xf32>
    %cst_12 = arith.constant dense<0.000000e+00> : vector<2x16xf32>
    %15 = vector.multi_reduction <add>, %14, %cst_12 [2] : vector<2x16x16xf32> to vector<2x16xf32>
    %16 = vector.shape_cast %15 : vector<2x16xf32> to vector<2x16x1xf32>
    %17 = tpu.reciprocal %16 : vector<2x16x1xf32> -> vector<2x16x1xf32>
    %18 = vector.broadcast %17 : vector<2x16x1xf32> to vector<2x16x16xf32>
    %19 = arith.mulf %14, %18 : vector<2x16x16xf32>
    %c0_13 = arith.constant 0 : index
    %c0_14 = arith.constant 0 : index
    %c0_15 = arith.constant 0 : index
    %20 = vector.load %arg7[%c0_13, %c0_14, %c0_15] : memref<2x16x16xf32, #tpu.memory_space<vmem>>, vector<2x16x16xf32>
    tpu.vector_store %arg7[%c0_13, %c0_14, %c0_15], %19 {strides = array<i32>} : memref<2x16x16xf32, #tpu.memory_space<vmem>>, vector<2x16x16xf32>,
    %c0_16 = arith.constant 0 : index
    %c0_17 = arith.constant 0 : index
    %c0_18 = arith.constant 0 : index
    %21 = vector.load %arg4[%c0_16, %c0_17, %c0_18] : memref<2x16x8xf32, #tpu.memory_space<vmem>>, vector<2x16x8xf32>
    %cst_19 = arith.constant dense<0.000000e+00> : vector<2x16x8xf32>
    %22 = tpu.matmul %19, %21, %cst_19 {dimension_numbers = #tpu.dot_dimension_numbers<[2], [1], [1], [2], [0, 0, 0, 1, 1, 2], [0], [0]>} : vector<2x16x16xf32>, vector<2x16x8xf32>, vector<2x16x8xf32> -> vector<2x16x8xf32>
    %23 = vector.extract_strided_slice %22 {offsets = [0, 0, 0], sizes = [1, 16, 8], strides = [1, 1, 1]} : vector<2x16x8xf32> to vector<1x16x8xf32>
    %24 = vector.shape_cast %23 : vector<1x16x8xf32> to vector<16x8xf32>
    %25 = vector.extract_strided_slice %22 {offsets = [1, 0, 0], sizes = [1, 16, 8], strides = [1, 1, 1]} : vector<2x16x8xf32> to vector<1x16x8xf32>
    %26 = vector.shape_cast %25 : vector<1x16x8xf32> to vector<16x8xf32>
    %27 = tpu.concatenate %24, %26 in 1 : vector<16x8xf32>, vector<16x8xf32> -> vector<16x16xf32>
    %c0_20 = arith.constant 0 : index
    %c0_21 = arith.constant 0 : index
    %c0_22 = arith.constant 0 : index
    %28 = vector.load %arg6[%c0_20, %c0_21, %c0_22] : memref<1x16x16xf32, #tpu.memory_space<vmem>>, vector<1x16x16xf32>
    %29 = vector.shape_cast %28 : vector<1x16x16xf32> to vector<16x16xf32>
    %30 = vector.shape_cast %27 : vector<16x16xf32> to vector<1x16x16xf32>
    tpu.vector_store %arg6[%c0_20, %c0_21, %c0_22], %30 {strides = array<i32>} : memref<1x16x16xf32, #tpu.memory_space<vmem>>, vector<1x16x16xf32>,
    return
  }
  func.func @transform_0(%arg0: i32, %arg1: i32) -> (i32, i32, i32) {
    %c0_i32 = arith.constant 0 : i32
    %c0_i32_0 = arith.constant 0 : i32
    return %arg0, %arg1, %c0_i32 : i32, i32, i32
  }
  func.func @transform_1(%arg0: i32, %arg1: i32) -> (i32, i32, i32) {
    %c0_i32 = arith.constant 0 : i32
    %c0_i32_0 = arith.constant 0 : i32
    %c0_i32_1 = arith.constant 0 : i32
    return %arg0, %c0_i32, %c0_i32_0 : i32, i32, i32
  }
  func.func @transform_2(%arg0: i32, %arg1: i32) -> (i32, i32, i32) {
    %c0_i32 = arith.constant 0 : i32
    %c0_i32_0 = arith.constant 0 : i32
    %c0_i32_1 = arith.constant 0 : i32
    return %arg0, %c0_i32, %c0_i32_0 : i32, i32, i32
  }
  func.func @transform_3(%arg0: i32, %arg1: i32) -> (i32, i32, i32) {
    %c0_i32 = arith.constant 0 : i32
    %c0_i32_0 = arith.constant 0 : i32
    return %arg0, %arg1, %c0_i32 : i32, i32, i32
  }
  func.func @transform_4(%arg0: i32, %arg1: i32) -> (i32, i32, i32) {
    %c0_i32 = arith.constant 0 : i32
    %c0_i32_0 = arith.constant 0 : i32
    return %arg0, %arg1, %c0_i32 : i32, i32, i32
  }
  func.func @transform_5(%arg0: i32, %arg1: i32) -> (i32, i32, i32) {
    %c0_i32 = arith.constant 0 : i32
    %c0_i32_0 = arith.constant 0 : i32
    return %arg0, %arg1, %c0_i32 : i32, i32, i32
  }
}

</mosaic_0001>

<bundles_post_ra>
// kernel: tpu_custom_call.1
= control target key start
LH: loop header
LB: loop body
LE: loop exit
PB: predicated region body
PF: predicated region fallthrough
CT: control target
= control target key end

     0   :  { %11 = vsyncpa [#allocation3], 0  ;;  %s1533_s0 = inlined_call_operand.vmem [shape: f32[4,16,8], index: 0, kind: input, shape index: {}]   ;;  %s1534_s1 = inlined_call_operand.vmem [shape: f32[4,16,8], index: 1, kind: input, shape index: {}]   ;;  %s1535_s2 = inlined_call_operand.vmem [shape: f32[4,16,8], index: 2, kind: input, shape index: {}]   ;;  %s1536_s3 = inlined_call_operand.vmem [shape: f32[4,16,16], index: 3, kind: input, shape index: {}]   ;;  %s1537_s4 = inlined_call_operand.hbm [shape: f32[2,16,16], index: 4, kind: output, shape index: {0}]   ;;  %s1538_s5 = inlined_call_operand.hbm [shape: f32[4,16,16], index: 5, kind: output, shape index: {1}]  }
   0x1   :  { %13 = vsyncpa [#allocation3 + $0x1], 0 }
   0x2   :  { %14 = vsyncpa [#allocation5], 0 }
   0x3   :  { %16 = vsyncpa [#allocation5 + $0x1], 0  ;;  %s1322_s18 = smov 0   ;;  %s1324_s19 = smov 0  }
   0x4   :  { %s1326_s20 = smov 0   ;;  %s1328_s21 = smov 0  }
   0x5   :  { %s1330_s22 = smov 0   ;;  %s1332_s23 = smov 0  }
   0x6 LB: > { %s987_s24 = sadd.s32 4294967295, %s1286_s23   ;;  %s988_s25 = sadd.s32 4294967294, %s1286_s23   ;;  %s1286_s23 = sphi %s1332_s23, %s22_s23   ;;  %s1282_s22 = sphi %s1330_s22, %s1547_s22   ;;  %s1278_s21 = sphi %s1328_s21, %s1546_s21   ;;  %s1274_s20 = sphi %s1326_s20, %s1545_s20   ;;  %s1270_s19 = sphi %s1324_s19, %s1544_s19   ;;  %s1266_s18 = sphi %s1322_s18, %s1543_s18  }
   0x7   : > { %s34_s26 = sadd.s32 1, %s1282_s22  ;;  %s151_s27 = sadd.s32 1, %s1274_s20 }
   0x8   : > { %p36_p0 = scmp.ge.s32.totalorder %s34_s26, 2  ;;  %p161_p1 = scmp.ne.s32.totalorder %s1274_s20, %s1270_s19 }
   0x9   : > { %p162_p2 = scmp.eq.s32.totalorder %s987_s24, 1  ;;  %p167_p3 = scmp.ne.s32.totalorder %s1270_s19, %s1266_s18 }
   0xa   : > { %s1549_s26 = smov (%p36_p0, %s34_s26), 0  ;;  %p168_p5 = scmp.eq.s32.totalorder %s988_s25, 1 }
   0xb   : > { %p1362_p4 = por %p162_p2, %p161_p1  ;;  %s146_s29 = ssub.s32 %s1282_s22, %s1549_s26 }
   0xc   : > { %p991_p6 = scmp.ge.s32.totalorder %s1286_s23, 1  ;;  %p149_p7 = scmp.eq.s32.totalorder %s146_s29, 0 }
   0xd   : > { %p1369_p8 = por %p168_p5, %p167_p3  ;;  %p264_p9 = scmp.lt.s32.totalorder %s1286_s23, 3 }
   0xe   : > { %s1375_s6 = scalar_select %p149_p7, %s1274_s20, %s151_s27  }
   0xf   : > { %p265_p10 = pnand %p991_p6, %p264_p9 }
  0x10   : > { %s994_s7 = sshll.u32 (!%p265_p10), %s1278_s21, 1  ;;  %vm377_vm0 = vcmask (!%p265_p10), 64512   ;;  %vm564_vm5 = vcmask (!%p265_p10), 130048   ;;  %s1423_s29 = sand.u32 (!%p265_p10), 1, %s1270_s19  }
  0x11   : > { %268 = sbr.rel (%p265_p10) target bundleno = 915 (0x393), region = 36  ;;  %p326_p11 = scmp.lt.s32.totalorder (!%p265_p10), %s994_s7, 3  ;;  %vm1386_vm1 = vmpackc.low (!%p265_p10), %vm377_vm0, %vm377_vm0 }
  0x12   : > { %s1033_s9 = sshll.u32 (!%p265_p10), %s1278_s21, 9  ;;  %s1288_s16 = smov (!%p265_p10), [#allocation4]  }
  0x13   : > { %s1438_s12 = scalar_lea.hbm (!%p265_p10), %s1538_s5, %s1033_s9 }
  0x18   : > { %s1551_s7 = smov (!%p326_p11, %s994_s7), 3 }
  0x19   : > { %s1378_s8 = sshll.u32 %s1551_s7, 4  ;;  %s993_s7 = sshll.u32 %s1423_s29, 5 }
  0x1a   : > { %s341_s11 = scalar_lea.vmem %s1534_s1, %s1378_s8  ;;  %s333_s14 = scalar_lea.vmem %s1533_s0, %s1378_s8 }
  0x1b   : > { %v373_v1 = vld [vmem:[%s341_s11] sm:$0xff]  ;;  %v374_v2 = vld [vmem:[%s341_s11 + $0x8] sm:$0xff]  ;;  %v375_v3 = vld [vmem:[%s341_s11 + $0x10] sm:$0xff]  ;;  %s359_s17 = scalar_lea.vmem %s1536_s3, %s1378_s8  ;;  %s348_s27 = scalar_lea.vmem %s1535_s2, %s1378_s8 }
  0x1c   : > { %v1078_v4 = vpack.c.bf16 %v374_v2, %v373_v1  ;;  %v376_v5 = vld [vmem:[%s341_s11 + $0x18] sm:$0xff]  ;;  %v365_v6 = vld [vmem:[%s333_s14] sm:$0xff]  ;;  %v367_v7 = vld [vmem:[%s333_s14 + $0x10] sm:$0xff]  ;;  %s323_s8 = scalar_lea.vmem [#allocation4], %s993_s7 }
  0x1d   : > { %v1084_v8 = vpack.c.bf16 %v376_v5, %v375_v3  ;;  %v369_v9 = vmul.f32 0.35355338, %v365_v6  ;;  %v371_v10 = vmul.f32 0.35355338, %v367_v7  ;;  %v366_v11 = vld [vmem:[%s333_s14 + $0x8] sm:$0xff]  ;;  %v368_v12 = vld [vmem:[%s333_s14 + $0x18] sm:$0xff] }
  0x1e   : > { %1080 = vmatprep.subr.msk.bf16.mxu0 %vm1386_vm1, %v1078_v4  ;;  %v370_v13 = vmul.f32 0.35355338, %v366_v11  ;;  %v372_v14 = vmul.f32 0.35355338, %v368_v12  ;;  %v553_v15 = vld [vmem:[%s359_s17 + $0x8] sm:$0xff]  ;;  %v552_v16 = vld [vmem:[%s359_s17] sm:$0xff] }
  0x1f   : > { %1086 = vmatprep.subr.msk.bf16.mxu1 %vm1386_vm1, %v1084_v8  ;;  %1083 = vmatpush3.bf16.xpose.msk.msra.mxu0 %vm1386_vm1, %v1078_v4  ;;  %v554_v17 = vld [vmem:[%s359_s17 + $0x10] sm:$0xff]  ;;  %vm557_vm2 = vcmp.eq.f32.partialorder %v553_v15, 0.0  ;;  %v555_v18 = vld [vmem:[%s359_s17 + $0x18] sm:$0xff]  ;;  %vm556_vm3 = vcmp.eq.f32.partialorder %v552_v16, 0.0  ;;  %v613_v54 = vld [vmem:[%s348_s27] sm:$0xff]  ;;  %s831_s13 = sshll.u32 %s323_s8, 4  ;;  %s1440_s13 = int_to_ptr.vmem [resolvable:$true] %s831_s13 }
  0x20   : > { %1089 = vmatpush3.bf16.xpose.msk.msra.mxu1 %vm1386_vm1, %v1084_v8  ;;  %1054 = vmatprep.mubr.msk.f32.mxu0 %vm377_vm0, %v369_v9  ;;  %vm558_vm4 = vcmp.eq.f32.partialorder %v554_v17, 0.0  ;;  %vm559_vm6 = vcmp.eq.f32.partialorder %v555_v18, 0.0  ;;  %v615_v51 = vld [vmem:[%s348_s27 + $0x10] sm:$0xff]  ;;  %v616_v52 = vld [vmem:[%s348_s27 + $0x18] sm:$0xff]  ;;  %v614_v55 = vld [vmem:[%s348_s27 + $0x8] sm:$0xff]  ;;  %s797_s14 = scalar_lea.sflag [#allocation5], %s1423_s29 }
  0x21   : > { %1061 = vmatprep.mubr.msk.f32.mxu1 %vm377_vm0, %v371_v10  ;;  %v1094_v53 = vpack.c.bf16 %v616_v52, %v615_v51  ;;  %v1090_v56 = vpack.c.bf16 %v614_v55, %v613_v54  ;;  %s1176_s15 = scalar_lea.vmem %s1440_s13, 512  ;;  %s1180_s17 = sshll.u32 %s1288_s16, 4  ;;  %s1181_s17 = int_to_ptr.vmem [resolvable:$false] %s1180_s17 }
  0x22   : > { %p1177_p12 = scmp.ne.s32.totalorder %s1440_s13, %s1176_s15  ;;  %s1182_s24 = scalar_lea.vmem %s1181_s17, 1024 }
  0x23   : > { %1095 = vmatprep.subr.bf16.mxu1 %v1094_v53  ;;  %1091 = vmatprep.subr.bf16.mxu0 %v1090_v56  ;;  %p1183_p1 = scmp.lt.s32.totalorder %s1440_s13, %s1181_s17  ;;  %p1184_p2 = scmp.lt.s32.totalorder %s1182_s24, %s1176_s15 }
  0x24   : > { %p1178_p13 = pnand %p1177_p12, %p1362_p4 }
  0x25   : > { %p1185_p3 = por %p1184_p2, %p1183_p1 }
  0x26   : > { %1055 = vmatmul.mubr.msk.f32.vlgmr.msra.gmra.mrb[0].mxu0 %vm377_vm0, %v370_v13  ;;  %p1179_p0 = pneg %p1178_p13 }
  0x27   : > { %1062 = vmatmul.mubr.msk.f32.vlgmr.msra.gmra.mrb[0].mxu1 %vm377_vm0, %v372_v14  ;;  %1093 = vmatpush3.bf16.msra.mxu0 %v1090_v56 }
  0x28   : > { %1097 = vmatpush3.bf16.msra.mxu1 %v1094_v53  ;;  %p1186_p5 = pnand %p1185_p3, %p1179_p0 }
  0xf9   : > { %v1056_v19 = vpop.f32.mrb[0].mxu0 }
  0xfa   : > { %v1063_v20 = vpop.f32.mrb[0].mxu1  ;;  %v456_v21 = vpop.f32.mrb[1].mxu0  ;;  %v561_v22 = vsel %vm557_vm2, -1e+30, %v1056_v19 }
  0xfb   : > { %v560_v23 = vsel %vm556_vm3, -1e+30, %v456_v21  ;;  %v543_v24 = vpop.f32.mrb[1].mxu1  ;;  %v563_v28 = vsel %vm559_vm6, -1e+30, %v1063_v20  ;;  %v568_v29 = vsel %vm564_vm5, %v561_v22, -inf }
  0xfc   : > { %v562_v25 = vsel %vm558_vm4, -1e+30, %v543_v24  ;;  %v565_v26 = vsel %vm564_vm5, %v560_v23, -inf  ;;  %v574_v30 = vsel %vm564_vm5, %v563_v28, -inf }
  0xfd   : > { %v571_v27 = vsel %vm564_vm5, %v562_v25, -inf  ;;  %566 = vmax.xlane.f32.xlu1 %v565_v26 }
  0xfe   : > { %572 = vmax.xlane.f32.xlu0 %v571_v27 }
 0x101   : > { %569 = vmax.xlane.f32.xlu1 %v568_v29 }
 0x102   : > { %575 = vmax.xlane.f32.xlu0 %v574_v30 }
 0x18a   : > { %v567_v31 = vpop.xlane.xlu1 %566 }
 0x18b   : > { %v573_v32 = vpop.xlane.xlu0 %572  ;;  %v577_v33 = vsub.f32 %v560_v23, %v567_v31 }
 0x18c   : > { %v579_v34 = vsub.f32 %v562_v25, %v573_v32 }
 0x18d   : > { %v581_v36 = vmul.f32 1.442695, %v577_v33 }
 0x18e   : > { %v585_v35 = vmul.f32 1.442695, %v579_v34  ;;  %v570_v37 = vpop.xlane.xlu1 %569 }
 0x18f   : > { %v576_v38 = vpop.xlane.xlu0 %575  ;;  %v578_v39 = vsub.f32 %v561_v22, %v570_v37 }
 0x190   : > { %1160 = vpow2.f32 %v585_v35  ;;  %v580_v40 = vsub.f32 %v563_v28, %v576_v38 }
 0x191   : > { %1162 = vpow2.f32 %v581_v36  ;;  %v583_v42 = vmul.f32 1.442695, %v578_v39 }
 0x192   : > { %v587_v41 = vmul.f32 1.442695, %v580_v40 }
 0x194   : > { %1164 = vpow2.f32 %v587_v41 }
 0x195   : > { %1166 = vpow2.f32 %v583_v42 }
 0x19a   : > { %v1161_v43 = vpop.eup %1160 }
 0x19b   : > { %v595_v44 = vsel %vm564_vm5, %v1161_v43, 0.0  ;;  %v1163_v45 = vpop.eup %1162 }
 0x19c   : > { %596 = vadd.xlane.f32.xlu0 %v595_v44  ;;  %v589_v48 = vsel %vm564_vm5, %v1163_v45, 0.0 }
 0x19e   : > { %v1165_v46 = vpop.eup %1164 }
 0x19f   : > { %v598_v47 = vsel %vm564_vm5, %v1165_v46, 0.0  ;;  %v1167_v49 = vpop.eup %1166 }
 0x1a0   : > { %599 = vadd.xlane.f32.xlu1 %v598_v47  ;;  %590 = vadd.xlane.f32.xlu0 %v589_v48  ;;  %v592_v50 = vsel %vm564_vm5, %v1167_v49, 0.0 }
 0x1a4   : > { %593 = vadd.xlane.f32.xlu1 %v592_v50 }
 0x229   : > { %v597_v57 = vpop.xlane.xlu0 %596 }
 0x22a   : > { %1168 = vrcp.f32 %v597_v57 }
 0x22d   : > { %v591_v58 = vpop.xlane.xlu0 %590  ;;  %v600_v59 = vpop.xlane.xlu1 %599 }
 0x22e   : > { %1170 = vrcp.f32 %v591_v58 }
 0x22f   : > { %1172 = vrcp.f32 %v600_v59 }
 0x231   : > { %v594_v60 = vpop.xlane.xlu1 %593 }
 0x232   : > { %1174 = vrcp.f32 %v594_v60 }
 0x234   : > { %v1169_v61 = vpop.eup %1168 }
 0x235   : > { %v607_v62 = vmul.f32 %v1169_v61, %v1161_v43 }
 0x237   : > { %1075 = vmatprep.mubr.msk.f32.mxu1 %vm564_vm5, %v607_v62  ;;  %611 = vst.msk [vmem:[%s323_s8 + $0x10] sm:$0xff] %vm564_vm5, %v607_v62 }
 0x238   : > { %v1171_v63 = vpop.eup %1170 }
 0x239   : > { %v1173_v0 = vpop.eup %1172  ;;  %v605_v1 = vmul.f32 %v1171_v63, %v1163_v45 }
 0x23a   : > { %v608_v2 = vmul.f32 %v1173_v0, %v1165_v46 }
 0x23b   : > { %1068 = vmatprep.mubr.msk.f32.mxu0 %vm564_vm5, %v605_v1  ;;  %609 = vst.msk [vmem:[%s323_s8] sm:$0xff] %vm564_vm5, %v605_v1 }
 0x23c   : > { %v1175_v3 = vpop.eup %1174  ;;  %1076 = vmatmul.mubr.msk.f32.vlgmr.msra.gmra.mrb[2].mxu1 %vm564_vm5, %v608_v2  ;;  %612 = vst.msk [vmem:[%s323_s8 + $0x18] sm:$0xff] %vm564_vm5, %v608_v2 }
 0x23d   : > { %v606_v4 = vmul.f32 %v1175_v3, %v1167_v49 }
 0x23f   : > { %1069 = vmatmul.mubr.msk.f32.vlgmr.msra.gmra.mrb[2].mxu0 %vm564_vm5, %v606_v4  ;;  %610 = vst.msk [vmem:[%s323_s8 + $0x8] sm:$0xff] %vm564_vm5, %v606_v4 }
 0x240   : > { %1189 = shalt.err (!%p1186_p5)
}
 0x241   : > { %s1190_s25 = scalar_lea.hbm %s1438_s12, 512  ;;  %s1194_s8 = scalar_lea.hbm %s1538_s5, 1024 }
 0x242   : > { %p1191_p6 = scmp.ne.s32.totalorder %s1438_s12, %s1190_s25  ;;  %p1195_p10 = scmp.lt.u32.totalorder %s1438_s12, %s1538_s5 }
 0x243   : > { %p1196_p11 = scmp.lt.u32.totalorder %s1194_s8, %s1190_s25  ;;  %p1198_p13 = scmp.lt.u32.totalorder %s1190_s25, %s1438_s12 }
 0x244   : > { %p1192_p7 = pnand %p1191_p6, %p1362_p4 }
 0x245   : > { %p1197_p12 = por %p1196_p11, %p1195_p10 }
 0x246   : > { %p1193_p9 = pneg %p1192_p7 }
 0x247   : > { %p1199_p0 = por %p1198_p13, %p1197_p12 }
 0x249   : > { %p1200_p1 = pnand %p1199_p0, %p1193_p9 }
 0x24b   : > { %1203 = shalt.err (!%p1200_p1)
}
 0x24c   : > { %s1289_s11 = smov 128   ;;  %s1290_s15 = smov 8  }
 0x24d   : > { %1099 = dma.vmem_to_hbm [thread:$0]  (%p1362_p4), %s1440_s13, 512, %s1438_s12, %s797_s14, %s1289_s11, %s1289_s11, %s1290_s15  }
 0x24e   : > { %s992_s16 = sshll.u32 %s1423_s29, 4  ;;  %s1031_s25 = sshll.u32 %s1278_s21, 8 }
 0x24f   : > { %s316_s17 = scalar_lea.vmem [#allocation2], %s992_s16  ;;  %s1479_s14 = scalar_lea.hbm %s1537_s4, %s1031_s25 }
 0x250   : > { %s812_s24 = sshll.u32 %s316_s17, 4  ;;  %s792_s21 = scalar_lea.sflag [#allocation3], %s1423_s29  ;;  %s1473_s24 = int_to_ptr.vmem [resolvable:$true] %s812_s24 }
 0x251   : > { %s1204_s27 = scalar_lea.vmem %s1473_s24, 256  ;;  %s1291_s7 = smov [#allocation2]  }
 0x252   : > { %p1205_p2 = scmp.ne.s32.totalorder %s1473_s24, %s1204_s27  ;;  %s1208_s8 = sshll.u32 %s1291_s7, 4  ;;  %s1209_s8 = int_to_ptr.vmem [resolvable:$false] %s1208_s8 }
 0x253   : > { %s1210_s9 = scalar_lea.vmem %s1209_s8, 512  ;;  %p1211_p6 = scmp.lt.s32.totalorder %s1473_s24, %s1209_s8 }
 0x254   : > { %p1206_p3 = pnand %p1205_p2, %p1362_p4  ;;  %p1212_p7 = scmp.lt.s32.totalorder %s1210_s9, %s1204_s27 }
 0x256   : > { %p1207_p5 = pneg %p1206_p3  ;;  %p1213_p9 = por %p1212_p7, %p1211_p6 }
 0x258   : > { %p1214_p10 = pnand %p1213_p9, %p1207_p5 }
 0x30f   : > { %v1077_v5 = vpop.f32.mrb[2].mxu1 }
 0x310   : > { %783 = vrot.lane.b32.xlu1 %v1077_v5, %s1290_s15  ;;  %v770_v6 = vpop.f32.mrb[3].mxu1 }
 0x311   : > { %781 = vrot.lane.b32.xlu0 %v770_v6, %s1290_s15 }
 0x312   : > { %v1070_v7 = vpop.f32.mrb[2].mxu0 }
 0x313   : > { %v689_v8 = vpop.f32.mrb[3].mxu0 }
 0x382   : > { %v784_v9 = vpop.permute.xlu1 %783 }
 0x383   : > { %v788_v10 = vsel %vm377_vm0, %v1070_v7, %v784_v9  ;;  %v782_v11 = vpop.permute.xlu0 %781 }
 0x384   : > { %790 = vst.msk [vmem:[%s316_s17 + $0x8] sm:$0xff] %vm564_vm5, %v788_v10  ;;  %v787_v12 = vsel %vm377_vm0, %v689_v8, %v782_v11 }
 0x385   : > { %789 = vst.msk [vmem:[%s316_s17] sm:$0xff] %vm564_vm5, %v787_v12 }
 0x386   : > { %1217 = shalt.err (!%p1214_p10)
}
 0x387   : > { %s1218_s10 = scalar_lea.hbm %s1479_s14, 256  ;;  %s1222_s25 = scalar_lea.hbm %s1537_s4, 512 }
 0x388   : > { %p1219_p11 = scmp.ne.s32.totalorder %s1479_s14, %s1218_s10  ;;  %p1223_p0 = scmp.lt.u32.totalorder %s1479_s14, %s1537_s4 }
 0x389   : > { %p1224_p1 = scmp.lt.u32.totalorder %s1222_s25, %s1218_s10  ;;  %p1226_p3 = scmp.lt.u32.totalorder %s1218_s10, %s1479_s14 }
 0x38a   : > { %p1220_p12 = pnand %p1219_p11, %p1362_p4 }
 0x38b   : > { %p1225_p2 = por %p1224_p1, %p1223_p0 }
 0x38c   : > { %p1221_p13 = pneg %p1220_p12 }
 0x38d   : > { %p1227_p5 = por %p1226_p3, %p1225_p2 }
 0x38f   : > { %p1228_p6 = pnand %p1227_p5, %p1221_p13 }
 0x391   : > { %1231 = shalt.err (!%p1228_p6)
}
 0x392   : > { %1098 = dma.vmem_to_hbm [thread:$0]  (%p1362_p4), %s1473_s24, 256, %s1479_s14, %s792_s21, %s1289_s11, %s1289_s11, %s1290_s15  }
 0x393 PF: > { %p1109_p7 = scmp.ge.s32.totalorder %s1286_s23, 2  ;;  %s846_s27 = sand.u32 1, %s1266_s18  }
 0x394   : > { %s847_s7 = scalar_lea.sflag [#allocation3], %s846_s27 }
 0x395   : > { %p1103_p9 = pnand %p1109_p7, %p1369_p8 }
 0x397   : > { %1257 = dma.done.wait (!%p1103_p9), %s847_s7, 256  }
 0x398   : > { %1259 = vsyncadd (!%p1103_p9), %s847_s7, 4294967040  ;;  %s856_s28 = scalar_lea.sflag [#allocation5], %s846_s27 }
 0x399   : > { %1261 = dma.done.wait (!%p1103_p9), %s856_s28, 512  }
 0x39a   : > { %1263 = vsyncadd (!%p1103_p9), %s856_s28, 4294966784  ;;  %s22_s23 = sadd.s32 1, %s1286_s23   ;;  %s1543_s18 = smov %s1270_s19 }
 0x39b   : > { %p19_p10 = scmp.ge.s32.totalorder %s22_s23, 4   ;;  %s1544_s19 = smov %s1274_s20 }
 0x39c   : > { %s1545_s20 = smov %s1375_s6  ;;  %s1546_s21 = smov %s1282_s22 }
 0x39d   : > { %s1547_s22 = smov %s1549_s26  ;;  %21 = sbr.rel (!%p19_p10) target bundleno = 6 (0x6), region = 97 }
 0x3a4   :  { %861 = vsyncpa [#allocation3], 1 }
 0x3a5   :  { %863 = vsyncpa [#allocation3 + $0x1], 1 }
 0x3a6   :  { %864 = vsyncpa [#allocation5], 1 }
 0x3a7   :  { %866 = vsyncpa [#allocation5 + $0x1], 1 }

</bundles_post_ra>
